<compile_context>
chip_gen: v5e
topology: v5e:2x2
jax: 0.10.0
libtpu: 0.0.40
codegen_flags: <defaults>
</compile_context>

<pallas_src>
import functools

import jax
import jax.numpy as jnp
from jax.experimental import pallas as pl
from jax.experimental.pallas import tpu as pltpu

F_IN, H1, H2, H3, F_OUT = 5, 128, 128, 5, 1
K_PAD = 8  # layer-1 contraction padded to one sublane group (5 feats + bias + 2 zero)


def _round_up(n, m):
    return ((n + m - 1) // m) * m


def _mlp_kernel(x_ref, w1_ref, w2_ref, b2_ref, w3_ref, b3_ref,
                w4t_ref, b4_ref, o_ref):
    # Feature-major: every activation is (features, TB); batch on the lane axis.
    # x_ref: (8, TB) bf16 -- rows 0..4 = features, row 5 = ones (bias), 6..7 = 0.

    # Layer 1 on the MXU (bf16 in, f32 accumulate); bias folded via the ones row.
    h1 = jnp.dot(w1_ref[...], x_ref[...],
                 preferred_element_type=jnp.float32)          # (128, TB) f32
    h1 = jnp.maximum(h1, 0.0).astype(jnp.bfloat16)            # (128, TB) bf16

    # Layer 2 (128x128): the dominant matmul, bf16 MXU fast path, f32 accumulate.
    h2 = jnp.dot(w2_ref[...], h1,
                 preferred_element_type=jnp.float32) + b2_ref[...]
    h2 = jnp.maximum(h2, 0.0).astype(jnp.bfloat16)            # (128, TB) bf16

    # Layer 3 (5x128): also on the bf16 MXU fast path.
    h3 = jnp.dot(w3_ref[...], h2,
                 preferred_element_type=jnp.float32) + b3_ref[...]
    h3 = jnp.maximum(h3, 0.0)                                  # (5, TB) f32

    # Layer 4 (N=1): VPU multiply + cross-sublane reduce (cheaper than an MXU
    # push/drain for a 5x1 weight).
    out = jnp.sum(w4t_ref[...] * h3, axis=0, keepdims=True) + b4_ref[...]
    o_ref[...] = out.astype(o_ref.dtype)                       # (1, TB) lane-dense


@functools.partial(jax.jit, static_argnames=("tb",))
def mlp_forward(x, params, *, tb=2048):
    """x: (B, 5) float.  params: PyTorch-layout weights (W: (out,in), b: (out,)).
    Returns (B, 1) float32."""
    B = x.shape[0]
    x = x.astype(jnp.float32)

    # Clamp the tile so tiny batches don't over-pad; at large B the default
    # tb=2048 amortizes grid-step overhead and still gives >=2 grid steps for
    # v7x's two TensorCores once B > tb.
    tb_eff = min(tb, _round_up(max(B, 1), 128))
    nt = pl.cdiv(B, tb_eff)
    b_pad = nt * tb_eff

    # Augmented feature-major input (8, b_pad), shipped as bf16:
    #   rows 0..4 = x.T, row 5 = 1.0 (bias row), rows 6..7 = 0.
    x_aug = jnp.zeros((K_PAD, b_pad), jnp.float32)
    x_aug = x_aug.at[:F_IN, :B].set(x.T)
    x_aug = x_aug.at[F_IN, :].set(1.0)
    x_aug = x_aug.astype(jnp.bfloat16)

    # Layer-1 weight augmented with the bias column (and zero-padded to K=8).
    w1_aug = jnp.zeros((H1, K_PAD), jnp.float32)
    w1_aug = w1_aug.at[:, :F_IN].set(params["w1"])
    w1_aug = w1_aug.at[:, F_IN].set(params["b1"])
    w1_aug = w1_aug.astype(jnp.bfloat16)

    w2 = params["w2"].astype(jnp.bfloat16)            # (128, 128)
    b2 = params["b2"].reshape(H2, 1)                  # f32
    w3 = params["w3"].astype(jnp.bfloat16)            # (5, 128)
    b3 = params["b3"].reshape(H3, 1)                  # f32
    w4t = params["w4"].T                              # (5, 1) f32
    b4 = params["b4"].reshape(F_OUT, 1)               # f32

    out = pl.pallas_call(
        _mlp_kernel,
        out_shape=jax.ShapeDtypeStruct((F_OUT, b_pad), jnp.float32),
        grid=(nt,),
        in_specs=[
            pl.BlockSpec((K_PAD, tb_eff), lambda i: (0, i)),   # x tile (pipelined)
            pl.BlockSpec((H1, K_PAD), lambda i: (0, 0)),       # w1+bias (VMEM-resident)
            pl.BlockSpec((H2, H1), lambda i: (0, 0)),          # w2 bf16 (resident)
            pl.BlockSpec((H2, 1), lambda i: (0, 0)),           # b2
            pl.BlockSpec((H3, H2), lambda i: (0, 0)),          # w3 bf16
            pl.BlockSpec((H3, 1), lambda i: (0, 0)),           # b3
            pl.BlockSpec((F_IN, F_OUT), lambda i: (0, 0)),     # w4^T
            pl.BlockSpec((F_OUT, 1), lambda i: (0, 0)),        # b4
        ],
        out_specs=pl.BlockSpec((F_OUT, tb_eff), lambda i: (0, i)),
        compiler_params=pltpu.CompilerParams(
            dimension_semantics=("parallel",)),
    )(x_aug, w1_aug, w2, b2, w3, b3, w4t, b4)

    return out[0, :B].reshape(B, 1)


def init_params(key):
    """Deterministic synthetic init, PyTorch layout: W (out, in), b (out,)."""
    dims = [(H1, F_IN), (H2, H1), (H3, H2), (F_OUT, H3)]
    params = {}
    for idx, (fan_out, fan_in) in enumerate(dims, start=1):
        key, kw, kb = jax.random.split(key, 3)
        bound = 1.0 / float(jnp.sqrt(float(fan_in)))
        params[f"w{idx}"] = jax.random.uniform(
            kw, (fan_out, fan_in), jnp.float32, minval=-bound, maxval=bound)
        params[f"b{idx}"] = jax.random.uniform(
            kb, (fan_out,), jnp.float32, minval=-bound, maxval=bound)
    return params


def _reference_forward_f32(x, params):
    h = jnp.maximum(x @ params["w1"].T + params["b1"], 0.0)
    h = jnp.maximum(h @ params["w2"].T + params["b2"], 0.0)
    h = jnp.maximum(h @ params["w3"].T + params["b3"], 0.0)
    return h @ params["w4"].T + params["b4"]


def _reference_forward_bf16(x, params):
    # Mirrors the kernel numerics: layers 1-3 with bf16 inputs / f32 accumulation,
    # layer-1 bias folded through a bf16 cast, layer 4 in f32.
    b1 = params["b1"].astype(jnp.bfloat16).astype(jnp.float32)
    h = jnp.dot(x.astype(jnp.bfloat16), params["w1"].T.astype(jnp.bfloat16),
                preferred_element_type=jnp.float32) + b1
    h = jnp.maximum(h, 0.0).astype(jnp.bfloat16)
    h = jnp.dot(h, params["w2"].T.astype(jnp.bfloat16),
                preferred_element_type=jnp.float32) + params["b2"]
    h = jnp.maximum(h, 0.0).astype(jnp.bfloat16)
    h = jnp.dot(h, params["w3"].T.astype(jnp.bfloat16),
                preferred_element_type=jnp.float32) + params["b3"]
    h = jnp.maximum(h, 0.0)
    return h @ params["w4"].T + params["b4"]


if __name__ == "__main__":
    key = jax.random.PRNGKey(0)
    key, kx = jax.random.split(key)

    B = 300   # deliberately not a multiple of the tile to exercise padding
    x = jax.random.normal(kx, (B, F_IN), dtype=jnp.float32)
    params = init_params(key)

    ref_bf16 = _reference_forward_bf16(x, params)
    ref_f32 = _reference_forward_f32(x, params)

    # Default (single large tile) and multi-step (exercises the grid pipeline
    # and the "parallel" batch axis) configurations.
    for tile in (2048, 128):
        out = mlp_forward(x, params, tb=tile)
        out = jax.block_until_ready(out)
        assert out.shape == (B, 1), out.shape
        assert jnp.allclose(out, ref_bf16, atol=2e-2, rtol=2e-2), \
            (tile, float(jnp.max(jnp.abs(out - ref_bf16))))
        assert jnp.allclose(out, ref_f32, atol=1.5e-1, rtol=5e-2), \
            (tile, float(jnp.max(jnp.abs(out - ref_f32))))

    print("KERNEL_OK")
</pallas_src>

<mosaic_0001>
module attributes {stable_mosaic.version = 11 : i64} {
  func.func @_mlp_kernel(%arg0: i32, %arg1: memref<8x384xbf16, #tpu.memory_space<vmem>>, %arg2: memref<128x8xbf16, #tpu.memory_space<vmem>>, %arg3: memref<128x128xbf16, #tpu.memory_space<vmem>>, %arg4: memref<128x1xf32, #tpu.memory_space<vmem>>, %arg5: memref<5x128xbf16, #tpu.memory_space<vmem>>, %arg6: memref<5x1xf32, #tpu.memory_space<vmem>>, %arg7: memref<5x1xf32, #tpu.memory_space<vmem>>, %arg8: memref<1x1xf32, #tpu.memory_space<vmem>>, %arg9: memref<1x384xf32, #tpu.memory_space<vmem>>) attributes {dimension_semantics = [#tpu.dimension_semantics<parallel>], iteration_bounds = array<i64: 1>, scalar_prefetch = 0 : i64, scratch_operands = 0 : i64, tpu.core_type = #tpu.core_type<tc>, window_params = [{transform_indices = @transform_0, window_bounds = array<i64: 8, 384>}, {pipeline_mode = #tpu.pipeline_mode<synchronous>, transform_indices = @transform_1, window_bounds = array<i64: 128, 8>}, {pipeline_mode = #tpu.pipeline_mode<synchronous>, transform_indices = @transform_2, window_bounds = array<i64: 128, 128>}, {pipeline_mode = #tpu.pipeline_mode<synchronous>, transform_indices = @transform_3, window_bounds = array<i64: 128, 1>}, {pipeline_mode = #tpu.pipeline_mode<synchronous>, transform_indices = @transform_4, window_bounds = array<i64: 5, 128>}, {pipeline_mode = #tpu.pipeline_mode<synchronous>, transform_indices = @transform_5, window_bounds = array<i64: 5, 1>}, {pipeline_mode = #tpu.pipeline_mode<synchronous>, transform_indices = @transform_6, window_bounds = array<i64: 5, 1>}, {pipeline_mode = #tpu.pipeline_mode<synchronous>, transform_indices = @transform_7, window_bounds = array<i64: 1, 1>}, {transform_indices = @transform_8, window_bounds = array<i64: 1, 384>}]} {
    %c0 = arith.constant 0 : index
    %c0_0 = arith.constant 0 : index
    %0 = vector.load %arg2[%c0, %c0_0] : memref<128x8xbf16, #tpu.memory_space<vmem>>, vector<128x8xbf16>
    %c0_1 = arith.constant 0 : index
    %c0_2 = arith.constant 0 : index
    %1 = vector.load %arg1[%c0_1, %c0_2] : memref<8x384xbf16, #tpu.memory_space<vmem>>, vector<8x384xbf16>
    %cst = arith.constant dense<0.000000e+00> : vector<128x384xf32>
    %2 = tpu.matmul %0, %1, %cst {dimension_numbers = #tpu.dot_dimension_numbers<[1], [0], [0], [1], [0, 0, 1, 1], [], []>} : vector<128x8xbf16>, vector<8x384xbf16>, vector<128x384xf32> -> vector<128x384xf32>
    %cst_3 = arith.constant 0.000000e+00 : f32
    %3 = vector.broadcast %cst_3 : f32 to vector<128x384xf32>
    %4 = arith.maximumf %2, %3 : vector<128x384xf32>
    %5 = arith.truncf %4 : vector<128x384xf32> to vector<128x384xbf16>
    %c0_4 = arith.constant 0 : index
    %c0_5 = arith.constant 0 : index
    %6 = vector.load %arg3[%c0_4, %c0_5] : memref<128x128xbf16, #tpu.memory_space<vmem>>, vector<128x128xbf16>
    %cst_6 = arith.constant dense<0.000000e+00> : vector<128x384xf32>
    %7 = tpu.matmul %6, %5, %cst_6 {dimension_numbers = #tpu.dot_dimension_numbers<[1], [0], [0], [1], [0, 0, 1, 1], [], []>} : vector<128x128xbf16>, vector<128x384xbf16>, vector<128x384xf32> -> vector<128x384xf32>
    %c0_7 = arith.constant 0 : index
    %c0_8 = arith.constant 0 : index
    %8 = vector.load %arg4[%c0_7, %c0_8] : memref<128x1xf32, #tpu.memory_space<vmem>>, vector<128x1xf32>
    %9 = vector.broadcast %8 : vector<128x1xf32> to vector<128x384xf32>
    %10 = arith.addf %7, %9 : vector<128x384xf32>
    %cst_9 = arith.constant 0.000000e+00 : f32
    %11 = vector.broadcast %cst_9 : f32 to vector<128x384xf32>
    %12 = arith.maximumf %10, %11 : vector<128x384xf32>
    %13 = arith.truncf %12 : vector<128x384xf32> to vector<128x384xbf16>
    %c0_10 = arith.constant 0 : index
    %c0_11 = arith.constant 0 : index
    %14 = vector.load %arg5[%c0_10, %c0_11] : memref<5x128xbf16, #tpu.memory_space<vmem>>, vector<5x128xbf16>
    %cst_12 = arith.constant dense<0.000000e+00> : vector<5x384xf32>
    %15 = tpu.matmul %14, %13, %cst_12 {dimension_numbers = #tpu.dot_dimension_numbers<[1], [0], [0], [1], [0, 0, 1, 1], [], []>} : vector<5x128xbf16>, vector<128x384xbf16>, vector<5x384xf32> -> vector<5x384xf32>
    %c0_13 = arith.constant 0 : index
    %c0_14 = arith.constant 0 : index
    %16 = vector.load %arg6[%c0_13, %c0_14] : memref<5x1xf32, #tpu.memory_space<vmem>>, vector<5x1xf32>
    %17 = vector.broadcast %16 : vector<5x1xf32> to vector<5x384xf32>
    %18 = arith.addf %15, %17 : vector<5x384xf32>
    %cst_15 = arith.constant 0.000000e+00 : f32
    %19 = vector.broadcast %cst_15 : f32 to vector<5x384xf32>
    %20 = arith.maximumf %18, %19 : vector<5x384xf32>
    %c0_16 = arith.constant 0 : index
    %c0_17 = arith.constant 0 : index
    %21 = vector.load %arg7[%c0_16, %c0_17] : memref<5x1xf32, #tpu.memory_space<vmem>>, vector<5x1xf32>
    %22 = vector.broadcast %21 : vector<5x1xf32> to vector<5x384xf32>
    %23 = arith.mulf %22, %20 : vector<5x384xf32>
    %cst_18 = arith.constant dense<0.000000e+00> : vector<384xf32>
    %24 = vector.multi_reduction <add>, %23, %cst_18 [0] : vector<5x384xf32> to vector<384xf32>
    %25 = vector.shape_cast %24 : vector<384xf32> to vector<1x384xf32>
    %c0_19 = arith.constant 0 : index
    %c0_20 = arith.constant 0 : index
    %26 = vector.load %arg8[%c0_19, %c0_20] : memref<1x1xf32, #tpu.memory_space<vmem>>, vector<1x1xf32>
    %27 = vector.broadcast %26 : vector<1x1xf32> to vector<1x384xf32>
    %28 = arith.addf %25, %27 : vector<1x384xf32>
    %c0_21 = arith.constant 0 : index
    %c0_22 = arith.constant 0 : index
    %29 = vector.load %arg9[%c0_21, %c0_22] : memref<1x384xf32, #tpu.memory_space<vmem>>, vector<1x384xf32>
    tpu.vector_store %arg9[%c0_21, %c0_22], %28 {strides = array<i32>} : memref<1x384xf32, #tpu.memory_space<vmem>>, vector<1x384xf32>,
    return
  }
  func.func @transform_0(%arg0: i32) -> (i32, i32) {
    %c0_i32 = arith.constant 0 : i32
    %c0_i32_0 = arith.constant 0 : i32
    return %c0_i32, %arg0 : i32, i32
  }
  func.func @transform_1(%arg0: i32) -> (i32, i32) {
    %c0_i32 = arith.constant 0 : i32
    %c0_i32_0 = arith.constant 0 : i32
    %c0_i32_1 = arith.constant 0 : i32
    return %c0_i32, %c0_i32_0 : i32, i32
  }
  func.func @transform_2(%arg0: i32) -> (i32, i32) {
    %c0_i32 = arith.constant 0 : i32
    %c0_i32_0 = arith.constant 0 : i32
    %c0_i32_1 = arith.constant 0 : i32
    return %c0_i32, %c0_i32_0 : i32, i32
  }
  func.func @transform_3(%arg0: i32) -> (i32, i32) {
    %c0_i32 = arith.constant 0 : i32
    %c0_i32_0 = arith.constant 0 : i32
    %c0_i32_1 = arith.constant 0 : i32
    return %c0_i32, %c0_i32_0 : i32, i32
  }
  func.func @transform_4(%arg0: i32) -> (i32, i32) {
    %c0_i32 = arith.constant 0 : i32
    %c0_i32_0 = arith.constant 0 : i32
    %c0_i32_1 = arith.constant 0 : i32
    return %c0_i32, %c0_i32_0 : i32, i32
  }
  func.func @transform_5(%arg0: i32) -> (i32, i32) {
    %c0_i32 = arith.constant 0 : i32
    %c0_i32_0 = arith.constant 0 : i32
    %c0_i32_1 = arith.constant 0 : i32
    return %c0_i32, %c0_i32_0 : i32, i32
  }
  func.func @transform_6(%arg0: i32) -> (i32, i32) {
    %c0_i32 = arith.constant 0 : i32
    %c0_i32_0 = arith.constant 0 : i32
    %c0_i32_1 = arith.constant 0 : i32
    return %c0_i32, %c0_i32_0 : i32, i32
  }
  func.func @transform_7(%arg0: i32) -> (i32, i32) {
    %c0_i32 = arith.constant 0 : i32
    %c0_i32_0 = arith.constant 0 : i32
    %c0_i32_1 = arith.constant 0 : i32
    return %c0_i32, %c0_i32_0 : i32, i32
  }
  func.func @transform_8(%arg0: i32) -> (i32, i32) {
    %c0_i32 = arith.constant 0 : i32
    %c0_i32_0 = arith.constant 0 : i32
    return %c0_i32, %arg0 : i32, i32
  }
}

</mosaic_0001>

<bundles_post_ra>
// kernel: mlp_forward.1
= control target key start
LH: loop header
LB: loop body
LE: loop exit
PB: predicated region body
PF: predicated region fallthrough
CT: control target
= control target key end

     0   :  { %vm123_vm0 = vcmask 1043456   ;;  %vm98_vm1 = vcmask 64512   ;;  %vm789_vm2 = vcmask 1044480   ;;  %vm826_vm3 = vcmask 1040384   ;;  %s1362_s0 = inlined_call_operand.vmem [shape: bf16[8,384], index: 0, kind: input, shape index: {}]   ;;  %s1363_s1 = inlined_call_operand.vmem [shape: bf16[128,8], index: 1, kind: input, shape index: {}]   ;;  %s1364_s3 = inlined_call_operand.vmem [shape: f32[128,1], index: 3, kind: input, shape index: {}]   ;;  %s1365_s2 = inlined_call_operand.vmem [shape: bf16[128,128], index: 2, kind: input, shape index: {}]   ;;  %s1366_s7 = inlined_call_operand.<no memory space> [shape: f32[1,1], index: 7, kind: input, shape index: {}]   ;;  %s1367_s5 = inlined_call_operand.vmem [shape: f32[5,1], index: 5, kind: input, shape index: {}]   ;;  %s1368_s6 = inlined_call_operand.vmem [shape: f32[5,1], index: 6, kind: input, shape index: {}]   ;;  %s1369_s4 = inlined_call_operand.vmem [shape: bf16[5,128], index: 4, kind: input, shape index: {}]   ;;  %s1370_s8 = inlined_call_operand.vmem [shape: f32[1,384], index: 8, kind: output, shape index: {}]  }
   0x1   :  { %v48_v0 = vld [vmem:[%s1362_s0] sm:$0xff]  ;;  %v933_v8 = vld [vmem:[%s1363_s1 + $0x28] sm:$0xff]  ;;  %v934_v14 = vld [vmem:[%s1363_s1 + $0x30] sm:$0xff]  ;;  %vm828_vm4 = vcmask 1041408  }
   0x2   :  { %v92_v1 = vunpack.c.l.b16 %v48_v0  ;;  %v93_v2 = vunpack.c.h.b16 %v48_v0  ;;  %v928_v7 = vld [vmem:[%s1363_s1] sm:$0xff]  ;;  %v49_v9 = vld [vmem:[%s1362_s0 + $0x8] sm:$0xf]  ;;  %v930_v15 = vld [vmem:[%s1363_s1 + $0x10] sm:$0xff] }
   0x3   :  { %v94_v10 = vunpack.c.l.b16 %v49_v9  ;;  %v929_v13 = vld [vmem:[%s1363_s1 + $0x8] sm:$0xff]  ;;  %v935_v16 = vld [vmem:[%s1363_s1 + $0x38] sm:$0xff]  ;;  %v932_v18 = vld [vmem:[%s1363_s1 + $0x20] sm:$0xff] }
   0x4   :  { %v95_v3 = vpack.c.b16 %v92_v1, %v92_v1  ;;  %v96_v4 = vpack.c.b16 %v93_v2, %v93_v2  ;;  %v931_v17 = vld [vmem:[%s1363_s1 + $0x18] sm:$0xff] }
   0x5   :  { %v97_v11 = vpack.c.b16 %v94_v10, %v94_v10 }
   0x6   :  { %v125_v5 = vsel %vm123_vm0, %v95_v3, 0  ;;  %v128_v6 = vsel %vm123_vm0, %v96_v4, 0 }
   0x7   :  { %140 = vmatpush.bf16.msra.mxu0 %v125_v5  ;;  %189 = vmatpush.bf16.msra.mxu1 %v128_v6  ;;  %v131_v12 = vsel %vm123_vm0, %v97_v11, 0 }
   0x8   :  { %945 = vmatpush.bf16.msra.mxu2 %v128_v6  ;;  %944 = vmatpush.bf16.msra.mxu3 %v125_v5 }
   0xa   :  { %872 = vmatmul.msk.bf16.vlgmr.msra.gmra.mxu0 %vm98_vm1, %v928_v7  ;;  %880 = vmatmul.msk.bf16.vlgmr.msra.gmra.mxu1 %vm98_vm1, %v928_v7 }
   0xb   :  { %885 = vmatmul.msk.bf16.vlgmr.msra.gmra.mxu2 %vm98_vm1, %v933_v8  ;;  %877 = vmatmul.msk.bf16.vlgmr.msra.gmra.mxu3 %vm98_vm1, %v933_v8 }
   0xc   :  { %238 = vmatpush.bf16.msrb.mxu2 %v131_v12 }
  0x1a   :  { %873 = vmatmul.msk.bf16.gmra.mxu0 %vm98_vm1, %v929_v13  ;;  %881 = vmatmul.msk.bf16.gmra.mxu1 %vm98_vm1, %v929_v13 }
  0x1b   :  { %886 = vmatmul.msk.bf16.gmra.mxu2 %vm98_vm1, %v934_v14  ;;  %878 = vmatmul.msk.bf16.gmra.mxu3 %vm98_vm1, %v934_v14 }
  0x2a   :  { %874 = vmatmul.msk.bf16.gmra.mxu0 %vm98_vm1, %v930_v15  ;;  %882 = vmatmul.msk.bf16.gmra.mxu1 %vm98_vm1, %v930_v15 }
  0x2b   :  { %887 = vmatmul.msk.bf16.gmra.mxu2 %vm98_vm1, %v935_v16  ;;  %879 = vmatmul.msk.bf16.gmra.mxu3 %vm98_vm1, %v935_v16 }
  0x3a   :  { %875 = vmatmul.msk.bf16.gmra.mxu0 %vm98_vm1, %v931_v17  ;;  %883 = vmatmul.msk.bf16.gmra.mxu1 %vm98_vm1, %v931_v17 }
  0x3b   :  { %888 = vmatmul.msk.bf16.vlgmr.msrb.gmra.mxu2 %vm98_vm1, %v928_v7 }
  0x4a   :  { %876 = vmatmul.msk.bf16.gmra.mxu0 %vm98_vm1, %v932_v18  ;;  %884 = vmatmul.msk.bf16.gmra.mxu1 %vm98_vm1, %v932_v18 }
  0x4b   :  { %889 = vmatmul.msk.bf16.gmra.mxu2 %vm98_vm1, %v929_v13 }
  0x5b   :  { %890 = vmatmul.msk.bf16.gmra.mxu2 %vm98_vm1, %v930_v15 }
  0x6b   :  { %891 = vmatmul.msk.bf16.gmra.mxu2 %vm98_vm1, %v931_v17 }
  0x7b   :  { %892 = vmatmul.msk.bf16.gmra.mxu2 %vm98_vm1, %v932_v18 }
  0x87   :  { %v1050_v19 = vpop.f32.mrf.mxu0  ;;  %v1052_v20 = vpop.f32.mrf.mxu1 }
  0x8b   :  { %893 = vmatmul.msk.bf16.gmra.mxu2 %vm98_vm1, %v933_v8 }
  0x8e   :  { %v216_v21 = vpop.f32.mrf.mxu2  ;;  %v167_v22 = vpop.f32.mrf.mxu3 }
  0x8f   :  { %v1055_v23 = vpop.f32.mrf.mxu0  ;;  %v1057_v24 = vpop.f32.mrf.mxu1  ;;  %v310_v54 = vmax.f32 %v167_v22, 0.0  ;;  %v311_v61 = vmax.f32 %v216_v21, 0.0 }
  0x96   :  { %v218_v25 = vpop.f32.mrf.mxu2  ;;  %v169_v26 = vpop.f32.mrf.mxu3 }
  0x97   :  { %v1059_v27 = vpop.f32.mrf.mxu0  ;;  %v1061_v28 = vpop.f32.mrf.mxu1  ;;  %v313_v56 = vmax.f32 %v169_v26, 0.0  ;;  %v314_v58 = vmax.f32 %v218_v25, 0.0 }
  0x99   :  { %v343_v0 = vpack.c.bf16 %v313_v56, %v310_v54  ;;  %v344_v1 = vpack.c.bf16 %v314_v58, %v311_v61  ;;  %v380_v56 = vld [vmem:[%s1364_s3 + $0x60] sm:$0xff]  ;;  %v1120_v58 = vld [vmem:[%s1365_s2 + $0x8] sm:$0xff] }
  0x9b   :  { %894 = vmatmul.msk.bf16.gmra.mxu2 %vm98_vm1, %v934_v14 }
  0x9e   :  { %v221_v29 = vpop.f32.mrf.mxu2  ;;  %v172_v30 = vpop.f32.mrf.mxu3 }
  0x9f   :  { %v1064_v31 = vpop.f32.mrf.mxu0  ;;  %v1066_v32 = vpop.f32.mrf.mxu1  ;;  %v316_v42 = vmax.f32 %v172_v30, 0.0  ;;  %v317_v55 = vmax.f32 %v221_v29, 0.0 }
  0xa6   :  { %v223_v33 = vpop.f32.mrf.mxu2  ;;  %v174_v34 = vpop.f32.mrf.mxu3 }
  0xa7   :  { %v1068_v35 = vpop.f32.mrf.mxu0  ;;  %v1070_v36 = vpop.f32.mrf.mxu1  ;;  %v319_v46 = vmax.f32 %v174_v34, 0.0  ;;  %v320_v51 = vmax.f32 %v223_v33, 0.0 }
  0xa8   :  { %v292_v25 = vmax.f32 %v1068_v35, 0.0  ;;  %v293_v26 = vmax.f32 %v1070_v36, 0.0  ;;  %v382_v35 = vld [vmem:[%s1364_s3 + $0x70] sm:$0xff]  ;;  %v289_v36 = vmax.f32 %v1064_v31, 0.0 }
  0xa9   :  { %v346_v57 = vpack.c.bf16 %v319_v46, %v316_v42  ;;  %v347_v59 = vpack.c.bf16 %v320_v51, %v317_v55  ;;  %v284_v46 = vmax.f32 %v1057_v24, 0.0 }
  0xab   :  { %895 = vmatmul.msk.bf16.gmra.mxu2 %vm98_vm1, %v935_v16 }
  0xae   :  { %v226_v37 = vpop.f32.mrf.mxu2  ;;  %v177_v38 = vpop.f32.mrf.mxu3 }
  0xaf   :  { %v1073_v39 = vpop.f32.mrf.mxu0  ;;  %v1075_v40 = vpop.f32.mrf.mxu1  ;;  %v322_v41 = vmax.f32 %v177_v38, 0.0  ;;  %v323_v45 = vmax.f32 %v226_v37, 0.0  ;;  %v286_v37 = vmax.f32 %v1059_v27, 0.0 }
  0xb0   :  { %v295_v29 = vmax.f32 %v1073_v39, 0.0  ;;  %v296_v30 = vmax.f32 %v1075_v40, 0.0  ;;  %v290_v39 = vmax.f32 %v1066_v32, 0.0  ;;  %v280_v32 = vmax.f32 %v1050_v19, 0.0 }
  0xb1   :  { %v331_v31 = vpack.c.bf16 %v289_v36, %v286_v37 }
  0xb2   :  { %v334_v40 = vpack.c.bf16 %v295_v29, %v292_v25  ;;  %v1181_v25 = vld [vmem:[%s1365_s2 + $0x28] sm:$0xff] }
  0xb6   :  { %v228_v43 = vpop.f32.mrf.mxu2  ;;  %v179_v44 = vpop.f32.mrf.mxu3 }
  0xb7   :  { %v326_v47 = vmax.f32 %v228_v43, 0.0  ;;  %v157_v48 = vpop.f32.mrf.mxu0  ;;  %v206_v49 = vpop.f32.mrf.mxu1  ;;  %v325_v50 = vmax.f32 %v179_v44, 0.0  ;;  %v335_v44 = vpack.c.bf16 %v296_v30, %v293_v26 }
  0xb8   :  { %v298_v11 = vmax.f32 %v157_v48, 0.0  ;;  %v299_v12 = vmax.f32 %v206_v49, 0.0  ;;  %v283_v48 = vmax.f32 %v1055_v23, 0.0 }
  0xb9   :  { %v350_v52 = vpack.c.bf16 %v326_v47, %v323_v45  ;;  %v349_v53 = vpack.c.bf16 %v325_v50, %v322_v41  ;;  %v287_v41 = vmax.f32 %v1061_v28, 0.0  ;;  %v950_v45 = vmov 0   ;;  %v383_v50 = vld [vmem:[%s1364_s3 + $0x78] sm:$0xff] }
  0xba   :  { %947 = vset.pattern.permute.xlu0 %v950_v45  ;;  %948 = vset.pattern.permute.xlu1 %v950_v45  ;;  %v281_v28 = vmax.f32 %v1052_v20, 0.0  ;;  %v1102_v20 = vld [vmem:[%s1365_s2] sm:$0xff] }
  0xbb   :  { %561 = vmatpush.bf16.msrb.mxu0 %v350_v52  ;;  %512 = vmatpush.bf16.msrb.mxu3 %v349_v53  ;;  %v332_v47 = vpack.c.bf16 %v290_v39, %v287_v41  ;;  %v328_v52 = vpack.c.bf16 %v283_v48, %v280_v32  ;;  %v376_v53 = vld [vmem:[%s1364_s3 + $0x40] sm:$0xff]  ;;  %v1188_v39 = vld [vmem:[%s1365_s2 + $0x30] sm:$0xff] }
  0xbc   :  { %456 = vperm.xlu0 %947, %v382_v35   ;;  %949 = vset.pattern.permute.xlu2 %v950_v45  ;;  %v329_v51 = vpack.c.bf16 %v284_v46, %v281_v28 }
  0xbd   :  { %446 = vperm.xlu1 %948, %v380_v56   ;;  %v732_v56 = vld [vmem:[%s1367_s5] sm:$0x1f] }
  0xbe   :  { %v240_v60 = vpop.f32.mrf.mxu2 }
  0xbf   :  { %562 = vmatpush.bf16.msrb.mxu0 %v347_v59  ;;  %v159_v62 = vpop.f32.mrf.mxu0  ;;  %v208_v63 = vpop.f32.mrf.mxu1  ;;  %513 = vmatpush.bf16.msrb.mxu3 %v346_v57  ;;  %v282_v3 = vmax.f32 %v240_v60, 0.0  ;;  %v375_v57 = vld [vmem:[%s1364_s3 + $0x38] sm:$0xff] }
  0xc0   :  { %v301_v15 = vmax.f32 %v159_v62, 0.0  ;;  %v302_v16 = vmax.f32 %v208_v63, 0.0  ;;  %v381_v62 = vld [vmem:[%s1364_s3 + $0x68] sm:$0xff]  ;;  %v378_v63 = vld [vmem:[%s1364_s3 + $0x50] sm:$0xff] }
  0xc1   :  { %436 = vperm.xlu2 %949, %v378_v63  }
  0xc2   :  { %v337_v33 = vpack.c.bf16 %v301_v15, %v298_v11  ;;  %v338_v34 = vpack.c.bf16 %v302_v16, %v299_v12  ;;  %v373_v12 = vld [vmem:[%s1364_s3 + $0x28] sm:$0xff]  ;;  %v368_v16 = vld [vmem:[%s1364_s3] sm:$0xff] }
  0xc3   :  { %563 = vmatpush.bf16.msrb.mxu0 %v344_v1  ;;  %514 = vmatpush.bf16.msrb.mxu3 %v343_v0  ;;  %v370_v0 = vld [vmem:[%s1364_s3 + $0x10] sm:$0xff] }
  0xc4   :  { %461 = vperm.xlu0 %947, %v383_v50  }
  0xc5   :  { %451 = vperm.xlu1 %948, %v381_v62  }
  0xc6   :  { %v242_v2 = vpop.f32.mrf.mxu2 }
  0xc7   :  { %v285_v4 = vmax.f32 %v242_v2, 0.0  ;;  %v162_v5 = vpop.f32.mrf.mxu0  ;;  %v211_v6 = vpop.f32.mrf.mxu1 }
  0xc8   :  { %v304_v8 = vmax.f32 %v162_v5, 0.0  ;;  %v305_v9 = vmax.f32 %v211_v6, 0.0  ;;  %v369_v5 = vld [vmem:[%s1364_s3 + $0x8] sm:$0xff]  ;;  %v1145_v6 = vld [vmem:[%s1365_s2 + $0x10] sm:$0xff] }
  0xc9   :  { %v1077_v7 = vpack.c.bf16 %v285_v4, %v282_v3  ;;  %v379_v3 = vld [vmem:[%s1364_s3 + $0x58] sm:$0xff]  ;;  %v377_v4 = vld [vmem:[%s1364_s3 + $0x48] sm:$0xff] }
  0xca   :  { %441 = vperm.xlu2 %949, %v379_v3  }
  0xcc   :  { %426 = vperm.xlu0 %947, %v376_v53  }
  0xcd   :  { %431 = vperm.xlu1 %948, %v377_v4  }
  0xce   :  { %v245_v10 = vpop.f32.mrf.mxu2 }
  0xcf   :  { %v164_v13 = vpop.f32.mrf.mxu0  ;;  %v213_v14 = vpop.f32.mrf.mxu1  ;;  %v288_v42 = vmax.f32 %v245_v10, 0.0  ;;  %v372_v10 = vld [vmem:[%s1364_s3 + $0x20] sm:$0xff] }
  0xd0   :  { %v307_v17 = vmax.f32 %v164_v13, 0.0  ;;  %v308_v18 = vmax.f32 %v213_v14, 0.0  ;;  %v371_v13 = vld [vmem:[%s1364_s3 + $0x18] sm:$0xff] }
  0xd1   :  { %v1164_v14 = vld [vmem:[%s1365_s2 + $0x18] sm:$0xff] }
  0xd2   :  { %v340_v21 = vpack.c.bf16 %v307_v17, %v304_v8  ;;  %v341_v22 = vpack.c.bf16 %v308_v18, %v305_v9  ;;  %v374_v9 = vld [vmem:[%s1364_s3 + $0x30] sm:$0xff]  ;;  %v1174_v18 = vld [vmem:[%s1365_s2 + $0x20] sm:$0xff] }
  0xd3   :  { %416 = vperm.xlu2 %949, %v374_v9  }
  0xd4   :  { %515 = vmatpush.bf16.msrb.mxu3 %v340_v21  ;;  %564 = vmatpush.bf16.msrb.mxu0 %v341_v22 }
  0xd5   :  { %421 = vperm.xlu0 %947, %v375_v57   ;;  %406 = vperm.xlu1 %948, %v372_v10  }
  0xd6   :  { %v247_v38 = vpop.f32.mrf.mxu2 }
  0xd7   :  { %v291_v43 = vmax.f32 %v247_v38, 0.0 }
  0xd8   :  { %516 = vmatpush.bf16.msrb.mxu3 %v337_v33  ;;  %565 = vmatpush.bf16.msrb.mxu0 %v338_v34 }
  0xd9   :  { %v1090_v27 = vpack.c.bf16 %v291_v43, %v288_v42 }
  0xdb   :  { %411 = vperm.xlu2 %949, %v373_v12  }
  0xdc   :  { %517 = vmatpush.bf16.msrb.mxu3 %v334_v40  ;;  %566 = vmatpush.bf16.msrb.mxu0 %v335_v44  ;;  %v1197_v44 = vld [vmem:[%s1365_s2 + $0x38] sm:$0xff] }
  0xdd   :  { %396 = vperm.xlu0 %947, %v370_v0   ;;  %401 = vperm.xlu1 %948, %v371_v13  }
  0xde   :  { %v250_v49 = vpop.f32.mrf.mxu2 }
  0xdf   :  { %v294_v24 = vmax.f32 %v250_v49, 0.0  ;;  %v13_v49 = vstv %s1366_s7 }
  0xe0   :  { %518 = vmatpush.bf16.msrb.mxu3 %v331_v31  ;;  %567 = vmatpush.bf16.msrb.mxu0 %v332_v47  ;;  %14 = vst [vmem:[#allocation2] sm:$0x1] %v13_v49 }
  0xe3   :  { %386 = vperm.xlu2 %949, %v368_v16  }
  0xe4   :  { %519 = vmatpush.bf16.msrb.mxu3 %v328_v52  ;;  %568 = vmatpush.bf16.msrb.mxu0 %v329_v51 }
  0xe5   :  { %391 = vperm.xlu0 %947, %v369_v5   ;;  %735 = vperm.xlu1 %948, %v732_v56  }
  0xe6   :  { %v252_v19 = vpop.f32.mrf.mxu2 }
  0xe7   :  { %v297_v23 = vmax.f32 %v252_v19, 0.0  ;;  %520 = vmatmul.bf16.vlgmr.msrb.gmra.mxu3 %v1102_v20  ;;  %569 = vmatmul.bf16.vlgmr.msrb.gmra.mxu0 %v1102_v20  ;;  %v811_v19 = vld [vmem:[#allocation2] sm:$0x1] }
  0xe9   :  { %v1109_v54 = vpack.c.bf16 %v297_v23, %v294_v24 }
  0xed   :  { %814 = vperm.xlu0 %947, %v811_v19  }
  0xee   :  { %v255_v55 = vpop.f32.mrf.mxu2 }
  0xef   :  { %v300_v60 = vmax.f32 %v255_v55, 0.0 }
  0xf6   :  { %v257_v59 = vpop.f32.mrf.mxu2 }
  0xf7   :  { %v303_v61 = vmax.f32 %v257_v59, 0.0  ;;  %525 = vmatmul.bf16.gmra.mxu3 %v1120_v58  ;;  %574 = vmatmul.bf16.gmra.mxu0 %v1120_v58 }
  0xf9   :  { %v339_v1 = vpack.c.bf16 %v303_v61, %v300_v60 }
  0xfe   :  { %v260_v2 = vpop.f32.mrf.mxu2 }
  0xff   :  { %v306_v36 = vmax.f32 %v260_v2, 0.0 }
 0x106   :  { %v262_v8 = vpop.f32.mrf.mxu2 }
 0x107   :  { %530 = vmatmul.bf16.gmra.mxu3 %v1145_v6  ;;  %579 = vmatmul.bf16.gmra.mxu0 %v1145_v6  ;;  %v309_v43 = vmax.f32 %v262_v8, 0.0 }
 0x109   :  { %v342_v40 = vpack.c.bf16 %v309_v43, %v306_v36  ;;  %v780_v43 = vld [vmem:[%s1368_s6] sm:$0x1f] }
 0x10a   :  { %783 = vperm.xlu2 %949, %v780_v43  }
 0x10e   :  { %v265_v11 = vpop.f32.mrf.mxu2 }
 0x10f   :  { %v312_v42 = vmax.f32 %v265_v11, 0.0 }
 0x116   :  { %v267_v15 = vpop.f32.mrf.mxu2 }
 0x117   :  { %535 = vmatmul.bf16.gmra.mxu3 %v1164_v14  ;;  %584 = vmatmul.bf16.gmra.mxu0 %v1164_v14  ;;  %v315_v38 = vmax.f32 %v267_v15, 0.0 }
 0x119   :  { %v345_v35 = vpack.c.bf16 %v315_v38, %v312_v42 }
 0x11b   :  { %v1212_v47 = vpop.permute.xlu2 %436 }
 0x11e   :  { %v270_v17 = vpop.f32.mrf.mxu2 }
 0x11f   :  { %v318_v37 = vmax.f32 %v270_v17, 0.0 }
 0x124   :  { %v1221_v50 = vpop.permute.xlu2 %441 }
 0x126   :  { %v272_v21 = vpop.f32.mrf.mxu2 }
 0x127   :  { %540 = vmatmul.bf16.gmra.mxu3 %v1174_v18  ;;  %589 = vmatmul.bf16.gmra.mxu0 %v1174_v18  ;;  %v321_v33 = vmax.f32 %v272_v21, 0.0 }
 0x129   :  { %v348_v41 = vpack.c.bf16 %v321_v33, %v318_v37 }
 0x12d   :  { %v1230_v23 = vpop.permute.xlu2 %416 }
 0x12e   :  { %v275_v22 = vpop.f32.mrf.mxu2  ;;  %v1203_v45 = vpop.permute.xlu0 %456 }
 0x12f   :  { %v324_v29 = vmax.f32 %v275_v22, 0.0 }
 0x135   :  { %v1242_v59 = vpop.permute.xlu2 %411 }
 0x136   :  { %v277_v26 = vpop.f32.mrf.mxu2  ;;  %v1208_v46 = vpop.permute.xlu0 %461 }
 0x137   :  { %v327_v30 = vmax.f32 %v277_v26, 0.0  ;;  %545 = vmatmul.bf16.gmra.mxu3 %v1181_v25  ;;  %594 = vmatmul.bf16.gmra.mxu0 %v1181_v25 }
 0x139   :  { %v351_v34 = vpack.c.bf16 %v327_v30, %v324_v29 }
 0x13b   :  { %610 = vmatpush.bf16.msrb.mxu1 %v351_v34 }
 0x13e   :  { %v1216_v48 = vpop.permute.xlu0 %426 }
 0x13f   :  { %611 = vmatpush.bf16.msrb.mxu1 %v348_v41 }
 0x143   :  { %612 = vmatpush.bf16.msrb.mxu1 %v345_v35 }
 0x147   :  { %613 = vmatpush.bf16.msrb.mxu1 %v342_v40  ;;  %550 = vmatmul.bf16.gmra.mxu3 %v1188_v39  ;;  %v1228_v24 = vpop.permute.xlu0 %421 }
 0x148   :  { %599 = vmatmul.bf16.gmra.mxu0 %v1188_v39 }
 0x14b   :  { %614 = vmatpush.bf16.msrb.mxu1 %v339_v1  ;;  %v1250_v1 = vpop.permute.xlu2 %386 }
 0x14f   :  { %615 = vmatpush.bf16.msrb.mxu1 %v1109_v54  ;;  %v1239_v57 = vpop.permute.xlu0 %396 }
 0x153   :  { %616 = vmatpush.bf16.msrb.mxu1 %v1090_v27 }
 0x157   :  { %617 = vmatpush.bf16.msrb.mxu1 %v1077_v7  ;;  %555 = vmatmul.bf16.gmra.mxu3 %v1197_v44  ;;  %v1248_v63 = vpop.permute.xlu0 %391 }
 0x158   :  { %604 = vmatmul.bf16.gmra.mxu0 %v1197_v44 }
 0x15a   :  { %618 = vmatmul.bf16.vlgmr.msrb.gmra.mxu1 %v1102_v20  ;;  %v1226_v20 = vpop.permute.xlu1 %446 }
 0x162   :  { %v1234_v55 = vpop.permute.xlu1 %451 }
 0x164   :  { %v1205_v28 = vpop.f32.mrf.mxu0 }
 0x16a   :  { %623 = vmatmul.bf16.gmra.mxu1 %v1120_v58  ;;  %v521_v27 = vpop.f32.mrf.mxu3  ;;  %v1246_v61 = vpop.permute.xlu1 %431 }
 0x16b   :  { %v522_v3 = vadd.f32 %v521_v27, %v1250_v1 }
 0x16c   :  { %v1210_v31 = vpop.f32.mrf.mxu0 }
 0x16d   :  { %v659_v9 = vmax.f32 %v522_v3, 0.0  ;;  %v573_v40 = vadd.f32 %v1210_v31, %v1248_v63 }
 0x16f   :  { %v663_v49 = vmax.f32 %v573_v40, 0.0 }
 0x172   :  { %v523_v7 = vpop.f32.mrf.mxu3 }
 0x173   :  { %v524_v2 = vadd.f32 %v523_v7, %v1248_v63 }
 0x174   :  { %v1214_v32 = vpop.f32.mrf.mxu0 }
 0x175   :  { %v662_v8 = vmax.f32 %v524_v2, 0.0 }
 0x177   :  { %v1260_v15 = vpack.c.bf16 %v662_v8, %v659_v9 }
 0x17a   :  { %628 = vmatmul.bf16.gmra.mxu1 %v1145_v6  ;;  %v526_v51 = vpop.f32.mrf.mxu3  ;;  %v1256_v6 = vpop.permute.xlu1 %406 }
 0x17b   :  { %v527_v30 = vadd.f32 %v526_v51, %v1239_v57 }
 0x17c   :  { %v1224_v52 = vpop.f32.mrf.mxu0 }
 0x17d   :  { %v665_v38 = vmax.f32 %v527_v30, 0.0 }
 0x182   :  { %v528_v53 = vpop.f32.mrf.mxu3  ;;  %v1267_v26 = vpop.permute.xlu1 %401 }
 0x183   :  { %v529_v34 = vadd.f32 %v528_v53, %v1267_v26 }
 0x184   :  { %v1232_v54 = vpop.f32.mrf.mxu0 }
 0x185   :  { %v668_v41 = vmax.f32 %v529_v34, 0.0 }
 0x187   :  { %v1279_v35 = vpack.c.bf16 %v668_v41, %v665_v38 }
 0x18a   :  { %633 = vmatmul.bf16.gmra.mxu1 %v1164_v14  ;;  %v531_v58 = vpop.f32.mrf.mxu3 }
 0x18b   :  { %v532_v19 = vadd.f32 %v531_v58, %v1256_v6 }
 0x18c   :  { %v1244_v60 = vpop.f32.mrf.mxu0 }
 0x192   :  { %v533_v62 = vpop.f32.mrf.mxu3 }
 0x193   :  { %v534_v7 = vadd.f32 %v533_v62, %v1242_v59  ;;  %v578_v62 = vadd.f32 %v1224_v52, %v1267_v26 }
 0x194   :  { %v585_v0 = vpop.f32.mrf.mxu0 }
 0x195   :  { %v586_v4 = vadd.f32 %v585_v0, %v1230_v23  ;;  %v674_v56 = vmax.f32 %v534_v7, 0.0  ;;  %v671_v0 = vmax.f32 %v532_v19, 0.0  ;;  %v669_v58 = vmax.f32 %v578_v62, 0.0 }
 0x197   :  { %v678_v11 = vmax.f32 %v586_v4, 0.0  ;;  %v1292_v4 = vpack.c.bf16 %v674_v56, %v671_v0 }
 0x19a   :  { %638 = vmatmul.bf16.gmra.mxu1 %v1174_v18  ;;  %v536_v5 = vpop.f32.mrf.mxu3 }
 0x19b   :  { %v537_v13 = vadd.f32 %v536_v5, %v1230_v23 }
 0x19c   :  { %v587_v10 = vpop.f32.mrf.mxu0 }
 0x19d   :  { %v588_v12 = vadd.f32 %v587_v10, %v1228_v24  ;;  %v677_v21 = vmax.f32 %v537_v13, 0.0 }
 0x19f   :  { %v681_v14 = vmax.f32 %v588_v12, 0.0  ;;  %v581_v12 = vadd.f32 %v1232_v54, %v1256_v6 }
 0x1a1   :  { %v1262_v16 = vpack.c.bf16 %v681_v14, %v678_v11  ;;  %v583_v11 = vadd.f32 %v1244_v60, %v1242_v59 }
 0x1a2   :  { %v538_v17 = vpop.f32.mrf.mxu3 }
 0x1a3   :  { %v539_v18 = vadd.f32 %v538_v17, %v1228_v24  ;;  %v675_v13 = vmax.f32 %v583_v11, 0.0 }
 0x1a4   :  { %v1265_v22 = vpop.f32.mrf.mxu0 }
 0x1a5   :  { %v680_v29 = vmax.f32 %v539_v18, 0.0 }
 0x1a7   :  { %v1270_v33 = vpack.c.bf16 %v680_v29, %v677_v21 }
 0x1aa   :  { %643 = vmatmul.bf16.gmra.mxu1 %v1181_v25  ;;  %v1274_v37 = vpop.f32.mrf.mxu3  ;;  %v571_v25 = vadd.f32 %v1205_v28, %v1250_v1  ;;  %v576_v28 = vadd.f32 %v1214_v32, %v1239_v57  ;;  %v672_v32 = vmax.f32 %v581_v12, 0.0 }
 0x1ac   :  { %v592_v42 = vpop.f32.mrf.mxu0  ;;  %v660_v51 = vmax.f32 %v571_v25, 0.0  ;;  %v666_v8 = vmax.f32 %v576_v28, 0.0  ;;  %v1305_v52 = vpack.c.bf16 %v675_v13, %v672_v32 }
 0x1ae   :  { %v1290_v2 = vpack.c.bf16 %v663_v49, %v660_v51  ;;  %v1299_v9 = vpack.c.bf16 %v669_v58, %v666_v8 }
 0x1b2   :  { %v1281_v36 = vpop.f32.mrf.mxu3 }
 0x1b4   :  { %v595_v27 = vpop.f32.mrf.mxu0 }
 0x1b5   :  { %v596_v41 = vadd.f32 %v595_v27, %v1212_v47 }
 0x1b7   :  { %v690_v8 = vmax.f32 %v596_v41, 0.0 }
 0x1ba   :  { %648 = vmatmul.bf16.gmra.mxu1 %v1188_v39  ;;  %v546_v53 = vpop.f32.mrf.mxu3 }
 0x1bb   :  { %v547_v11 = vadd.f32 %v546_v53, %v1212_v47  ;;  %v544_v53 = vadd.f32 %v1281_v36, %v1246_v61 }
 0x1bc   :  { %v597_v3 = vpop.f32.mrf.mxu0 }
 0x1bd   :  { %v598_v43 = vadd.f32 %v597_v3, %v1221_v50  ;;  %v593_v3 = vadd.f32 %v592_v42, %v1246_v61  ;;  %v542_v42 = vadd.f32 %v1274_v37, %v1216_v48 }
 0x1c2   :  { %v548_v31 = vpop.f32.mrf.mxu3 }
 0x1c3   :  { %v549_v13 = vadd.f32 %v548_v31, %v1221_v50 }
 0x1c5   :  { %v600_v5 = vpop.f32.mrf.mxu0 }
 0x1c6   :  { %v601_v29 = vadd.f32 %v600_v5, %v1226_v20 }
 0x1c8   :  { %v696_v7 = vmax.f32 %v601_v29, 0.0 }
 0x1ca   :  { %653 = vmatmul.bf16.gmra.mxu1 %v1197_v44  ;;  %v551_v39 = vpop.f32.mrf.mxu3 }
 0x1cb   :  { %v552_v56 = vadd.f32 %v551_v39, %v1226_v20 }
 0x1cd   :  { %v602_v10 = vpop.f32.mrf.mxu0 }
 0x1ce   :  { %v603_v30 = vadd.f32 %v602_v10, %v1234_v55 }
 0x1d0   :  { %v699_v49 = vmax.f32 %v603_v30, 0.0  ;;  %v689_v30 = vmax.f32 %v547_v11, 0.0 }
 0x1d2   :  { %v553_v14 = vpop.f32.mrf.mxu3  ;;  %v726_v12 = vpack.c.bf16 %v699_v49, %v696_v7 }
 0x1d3   :  { %v554_v0 = vadd.f32 %v553_v14, %v1234_v55 }
 0x1d5   :  { %v605_v17 = vpop.f32.mrf.mxu0  ;;  %v698_v32 = vmax.f32 %v554_v0, 0.0 }
 0x1d6   :  { %v606_v18 = vadd.f32 %v605_v17, %v1203_v45 }
 0x1d7   :  { %v619_v21 = vpop.f32.mrf.mxu1 }
 0x1d8   :  { %v702_v38 = vmax.f32 %v606_v18, 0.0  ;;  %v620_v60 = vadd.f32 %v619_v21, %v1250_v1  ;;  %v591_v1 = vadd.f32 %v1265_v22, %v1216_v48  ;;  %v695_v22 = vmax.f32 %v552_v56, 0.0 }
 0x1da   :  { %v556_v44 = vpop.f32.mrf.mxu3  ;;  %v661_v28 = vmax.f32 %v620_v60, 0.0  ;;  %v684_v18 = vmax.f32 %v591_v1, 0.0  ;;  %v683_v60 = vmax.f32 %v542_v42, 0.0 }
 0x1db   :  { %v557_v40 = vadd.f32 %v556_v44, %v1203_v45  ;;  %v687_v44 = vmax.f32 %v593_v3, 0.0 }
 0x1dd   :  { %v607_v34 = vpop.f32.mrf.mxu0  ;;  %v701_v58 = vmax.f32 %v557_v40, 0.0  ;;  %v720_v31 = vpack.c.bf16 %v687_v44, %v684_v18 }
 0x1de   :  { %v608_v54 = vadd.f32 %v607_v34, %v1208_v46  ;;  %v692_v34 = vmax.f32 %v549_v13, 0.0 }
 0x1df   :  { %v621_v25 = vpop.f32.mrf.mxu1 }
 0x1e0   :  { %v705_v51 = vmax.f32 %v608_v54, 0.0  ;;  %v622_v19 = vadd.f32 %v621_v25, %v1248_v63  ;;  %v693_v63 = vmax.f32 %v598_v43, 0.0  ;;  %v686_v54 = vmax.f32 %v544_v53, 0.0  ;;  %v784_v53 = vpop.permute.xlu2 %783 }
 0x1e1   :  { %v722_v41 = vpack.c.bf16 %v692_v34, %v689_v30 }
 0x1e2   :  { %v729_v62 = vpack.c.bf16 %v705_v51, %v702_v38  ;;  %v664_v27 = vmax.f32 %v622_v19, 0.0  ;;  %v558_v5 = vpop.f32.mrf.mxu3  ;;  %v723_v29 = vpack.c.bf16 %v693_v63, %v690_v8  ;;  %v725_v38 = vpack.c.bf16 %v698_v32, %v695_v22 }
 0x1e3   :  { %v559_v10 = vadd.f32 %v558_v5, %v1208_v46  ;;  %v719_v25 = vpack.c.bf16 %v686_v54, %v683_v60 }
 0x1e4   :  { %v1323_v39 = vpack.c.bf16 %v664_v27, %v661_v28  ;;  %751 = vmatpush.bf16.msra.mxu3 %v729_v62 }
 0x1e5   :  { %v704_v14 = vmax.f32 %v559_v10, 0.0 }
 0x1e7   :  { %v728_v17 = vpack.c.bf16 %v704_v14, %v701_v58  ;;  %v624_v21 = vpop.f32.mrf.mxu1 }
 0x1e8   :  { %752 = vmatpush.bf16.msra.mxu3 %v726_v12  ;;  %v625_v43 = vadd.f32 %v624_v21, %v1239_v57 }
 0x1e9   :  { %738 = vmatpush.bf16.msra.mxu2 %v728_v17 }
 0x1ea   :  { %v667_v7 = vmax.f32 %v625_v43, 0.0 }
 0x1ec   :  { %753 = vmatpush.bf16.msra.mxu3 %v723_v29 }
 0x1ed   :  { %739 = vmatpush.bf16.msra.mxu2 %v725_v38 }
 0x1ef   :  { %v626_v40 = vpop.f32.mrf.mxu1 }
 0x1f0   :  { %v627_v37 = vadd.f32 %v626_v40, %v1267_v26  ;;  %754 = vmatpush.bf16.msra.mxu3 %v720_v31 }
 0x1f1   :  { %740 = vmatpush.bf16.msra.mxu2 %v722_v41 }
 0x1f2   :  { %v670_v36 = vmax.f32 %v627_v37, 0.0 }
 0x1f4   :  { %v712_v49 = vpack.c.bf16 %v670_v36, %v667_v7  ;;  %755 = vmatpush.bf16.msra.mxu3 %v1262_v16  ;;  %v731_v16 = vld [vmem:[%s1369_s4] sm:$0x7] }
 0x1f5   :  { %741 = vmatpush.bf16.msra.mxu2 %v719_v25 }
 0x1f7   :  { %v629_v51 = vpop.f32.mrf.mxu1 }
 0x1f8   :  { %756 = vmatpush.bf16.msra.mxu3 %v1305_v52  ;;  %v630_v57 = vadd.f32 %v629_v51, %v1256_v6 }
 0x1f9   :  { %742 = vmatpush.bf16.msra.mxu2 %v1270_v33 }
 0x1fa   :  { %v673_v52 = vmax.f32 %v630_v57, 0.0 }
 0x1fc   :  { %757 = vmatpush.bf16.msra.mxu3 %v1299_v9 }
 0x1fd   :  { %743 = vmatpush.bf16.msra.mxu2 %v1292_v4 }
 0x1ff   :  { %v631_v26 = vpop.f32.mrf.mxu1 }
 0x200   :  { %v632_v19 = vadd.f32 %v631_v26, %v1242_v59  ;;  %758 = vmatpush.bf16.msra.mxu3 %v1290_v2 }
 0x201   :  { %744 = vmatpush.bf16.msra.mxu2 %v1279_v35 }
 0x202   :  { %v676_v56 = vmax.f32 %v632_v19, 0.0 }
 0x203   :  { %759 = vmatmul.bf16.vlgmr.msra.gmra.mxu3 %v731_v16 }
 0x204   :  { %v715_v33 = vpack.c.bf16 %v676_v56, %v673_v52 }
 0x205   :  { %745 = vmatpush.bf16.msra.mxu2 %v1260_v15 }
 0x207   :  { %v634_v4 = vpop.f32.mrf.mxu1 }
 0x208   :  { %746 = vmatmul.bf16.vlgmr.msra.gmra.mxu2 %v731_v16  ;;  %v635_v6 = vadd.f32 %v634_v4, %v1230_v23 }
 0x20a   :  { %v679_v2 = vmax.f32 %v635_v6, 0.0 }
 0x20f   :  { %v636_v9 = vpop.f32.mrf.mxu1 }
 0x210   :  { %v637_v59 = vadd.f32 %v636_v9, %v1228_v24 }
 0x212   :  { %v682_v0 = vmax.f32 %v637_v59, 0.0 }
 0x214   :  { %v718_v1 = vpack.c.bf16 %v682_v0, %v679_v2 }
 0x217   :  { %v639_v28 = vpop.f32.mrf.mxu1 }
 0x21f   :  { %v641_v62 = vpop.f32.mrf.mxu1 }
 0x220   :  { %v642_v17 = vadd.f32 %v641_v62, %v1246_v61 }
 0x227   :  { %v644_v27 = vpop.f32.mrf.mxu1 }
 0x228   :  { %v645_v32 = vadd.f32 %v644_v27, %v1212_v47  ;;  %v736_v47 = vpop.permute.xlu1 %735 }
 0x22a   :  { %v691_v18 = vmax.f32 %v645_v32, 0.0 }
 0x22f   :  { %v646_v35 = vpop.f32.mrf.mxu1 }
 0x230   :  { %v647_v12 = vadd.f32 %v646_v35, %v1221_v50 }
 0x237   :  { %v649_v5 = vpop.f32.mrf.mxu1 }
 0x238   :  { %v650_v11 = vadd.f32 %v649_v5, %v1226_v20 }
 0x23a   :  { %v697_v14 = vmax.f32 %v650_v11, 0.0 }
 0x23f   :  { %v651_v3 = vpop.f32.mrf.mxu1 }
 0x240   :  { %v652_v10 = vadd.f32 %v651_v3, %v1234_v55  ;;  %v640_v55 = vadd.f32 %v639_v28, %v1216_v48 }
 0x242   :  { %v700_v13 = vmax.f32 %v652_v10, 0.0  ;;  %v685_v42 = vmax.f32 %v640_v55, 0.0 }
 0x244   :  { %v727_v21 = vpack.c.bf16 %v700_v13, %v697_v14 }
 0x247   :  { %v654_v8 = vpop.f32.mrf.mxu1 }
 0x248   :  { %v655_v58 = vadd.f32 %v654_v8, %v1203_v45  ;;  %v694_v45 = vmax.f32 %v647_v12, 0.0 }
 0x24a   :  { %v703_v24 = vmax.f32 %v655_v58, 0.0  ;;  %v724_v20 = vpack.c.bf16 %v694_v45, %v691_v18 }
 0x24f   :  { %v656_v15 = vpop.f32.mrf.mxu1 }
 0x250   :  { %v657_v23 = vadd.f32 %v656_v15, %v1208_v46  ;;  %v688_v46 = vmax.f32 %v642_v17, 0.0  ;;  %v831_v15 = vlaneseq }
 0x252   :  { %v706_v63 = vmax.f32 %v657_v23, 0.0  ;;  %v721_v44 = vpack.c.bf16 %v688_v46, %v685_v42  ;;  %vm833_vm5 = vcmp.lt.s32.totalorder %v831_v15, 384 }
 0x254   :  { %v730_v22 = vpack.c.bf16 %v706_v63, %v703_v24 }
 0x256   :  { %764 = vmatpush.bf16.msrb.mxu2 %v730_v22 }
 0x25a   :  { %765 = vmatpush.bf16.msrb.mxu2 %v727_v21 }
 0x25e   :  { %766 = vmatpush.bf16.msrb.mxu2 %v724_v20 }
 0x262   :  { %767 = vmatpush.bf16.msrb.mxu2 %v721_v44 }
 0x266   :  { %768 = vmatpush.bf16.msrb.mxu2 %v718_v1 }
 0x26a   :  { %769 = vmatpush.bf16.msrb.mxu2 %v715_v33 }
 0x26e   :  { %770 = vmatpush.bf16.msrb.mxu2 %v712_v49  ;;  %v815_v49 = vpop.permute.xlu0 %814 }
 0x26f   :  { %v817_v19 = vperm.slane %v815_v49, 0 }
 0x272   :  { %771 = vmatpush.bf16.msrb.mxu2 %v1323_v39 }
 0x275   :  { %772 = vmatmul.bf16.vlgmr.msrb.gmra.mxu2 %v731_v16 }
 0x286   :  { %v760_v50 = vpop.f32.mrf.mxu3 }
 0x287   :  { %v761_v61 = vadd.f32 %v760_v50, %v736_v47 }
 0x289   :  { %v778_v29 = vmax.f32 %v761_v61, 0.0 }
 0x28b   :  { %v787_v48 = vmul.f32 %v784_v53, %v778_v29  ;;  %v747_v30 = vpop.f32.mrf.mxu2 }
 0x28c   :  { %v748_v34 = vadd.f32 %v747_v30, %v736_v47 }
 0x28d   :  { %v797_v38 = vsel %vm789_vm2, %v787_v48, 0.0 }
 0x28e   :  { %v798_v31 = vrot.slane %v797_v38, 4  ;;  %v777_v60 = vmax.f32 %v748_v34, 0.0  ;;  %v762_v54 = vpop.f32.mrf.mxu3 }
 0x290   :  { %v799_v41 = vadd.f32 %v798_v31, %v797_v38  ;;  %v786_v43 = vmul.f32 %v784_v53, %v777_v60 }
 0x292   :  { %v800_v40 = vrot.slane %v799_v41, 2  ;;  %v790_v39 = vsel %vm789_vm2, %v786_v43, 0.0 }
 0x293   :  { %v791_v37 = vrot.slane %v790_v39, 4  ;;  %v749_v25 = vpop.f32.mrf.mxu2 }
 0x294   :  { %v801_v7 = vadd.f32 %v800_v40, %v799_v41 }
 0x295   :  { %v792_v36 = vadd.f32 %v791_v37, %v790_v39 }
 0x296   :  { %v802_v51 = vrot.slane %v801_v7, 1 }
 0x297   :  { %v793_v57 = vrot.slane %v792_v36, 2 }
 0x298   :  { %v803_v26 = vadd.f32 %v802_v51, %v801_v7 }
 0x299   :  { %v794_v16 = vadd.f32 %v793_v57, %v792_v36 }
 0x29a   :  { %v819_v52 = vadd.f32 %v817_v19, %v803_v26 }
 0x29b   :  { %v795_v56 = vrot.slane %v794_v16, 1 }
 0x29c   :  { %v824_v4 = vrot.slane %v819_v52, 7 }
 0x29d   :  { %v796_v33 = vadd.f32 %v795_v56, %v794_v16 }
 0x29f   :  { %v818_v6 = vadd.f32 %v817_v19, %v796_v33 }
 0x2a1   :  { %v827_v9 = vsel %vm826_vm3, %v818_v6, %v824_v4 }
 0x2f8   :  { %v773_v59 = vpop.f32.mrf.mxu2 }
 0x2f9   :  { %v774_v2 = vadd.f32 %v773_v59, %v736_v47 }
 0x2fb   :  { %v779_v0 = vmax.f32 %v774_v2, 0.0 }
 0x2fd   :  { %v788_v1 = vmul.f32 %v784_v53, %v779_v0 }
 0x2ff   :  { %v804_v28 = vsel %vm789_vm2, %v788_v1, 0.0 }
 0x300   :  { %v805_v62 = vrot.slane %v804_v28, 4  ;;  %v775_v27 = vpop.f32.mrf.mxu2 }
 0x302   :  { %v806_v35 = vadd.f32 %v805_v62, %v804_v28 }
 0x304   :  { %v807_v5 = vrot.slane %v806_v35, 2 }
 0x306   :  { %v808_v3 = vadd.f32 %v807_v5, %v806_v35 }
 0x308   :  { %v809_v8 = vrot.slane %v808_v3, 1 }
 0x30a   :  { %v810_v58 = vadd.f32 %v809_v8, %v808_v3 }
 0x30c   :  { %v820_v10 = vadd.f32 %v817_v19, %v810_v58 }
 0x30e   :  { %v825_v23 = vrot.slane %v820_v10, 6 }
 0x310   :  { %v829_v11 = vsel %vm828_vm4, %v827_v9, %v825_v23 }
 0x311   :  { %835 = vst.msk [vmem:[%s1370_s8] sm:$0x7] %vm833_vm5, %v829_v11 }

</bundles_post_ra>
